<compile_context>
chip_gen: v5e
topology: v5e:2x2
jax: 0.10.0
libtpu: 0.0.40
codegen_flags: <defaults>
</compile_context>

<pallas_src>
import jax
import jax.numpy as jnp
from jax.experimental import pallas as pl
from jax.experimental.pallas import tpu as pltpu


def _round_up(x, m):
    return ((x + m - 1) // m) * m


def _vmem_capacity_bytes():
    # Trace-time hardware query only; falls back to the smallest part (v7x 64 MiB).
    # This never wraps kernel execution, so it cannot mask real kernel errors.
    try:
        return int(pltpu.get_tpu_info().vmem_capacity_bytes)
    except Exception:
        return 64 * 1024 * 1024


def _encoder_kernel(x_ref, w1_ref, b1_ref, w2_ref, b2_ref, o_ref):
    # fc1 on the MXU: bf16 operands (x cast in-kernel), f32 accumulate.
    x = x_ref[...].astype(jnp.bfloat16)
    h = jnp.dot(x, w1_ref[...], preferred_element_type=jnp.float32)
    # bias + ReLU in f32 on the VPU.
    h = jnp.maximum(h + b1_ref[...], 0.0)
    # fc2: re-feed the MXU in bf16, accumulate in f32, bias in f32.
    out = jnp.dot(h.astype(jnp.bfloat16), w2_ref[...],
                  preferred_element_type=jnp.float32) + b2_ref[...]
    o_ref[...] = out.astype(o_ref.dtype)


def prepare_encoder_params(fc1_w, fc1_b, fc2_w, fc2_b):
    """One-time layout prep of torch nn.Linear params.

    fc1_w: [hidden_dim, input_dim], fc1_b: [hidden_dim]
    fc2_w: [output_dim, hidden_dim], fc2_b: [output_dim]

    Returns padded/transposed/bf16-cast device arrays to be reused across calls
    (avoids a per-call HBM pad+transpose pass over the weights).
    """
    hidden_dim, input_dim = fc1_w.shape
    output_dim = fc2_w.shape[0]
    h_pad = _round_up(hidden_dim, 128)
    n_pad = _round_up(output_dim, 128)

    # torch [out,in] -> [in,out]; lane dims (H, N) zero-padded to 128 multiples,
    # K stays unpadded (full-extent block dim). MXU feeds in bf16, biases f32.
    w1_p = jnp.pad(fc1_w.T.astype(jnp.float32),
                   ((0, 0), (0, h_pad - hidden_dim))).astype(jnp.bfloat16)
    b1_p = jnp.pad(fc1_b.astype(jnp.float32), (0, h_pad - hidden_dim))[None, :]
    w2_p = jnp.pad(fc2_w.T.astype(jnp.float32),
                   ((0, h_pad - hidden_dim), (0, n_pad - output_dim))).astype(jnp.bfloat16)
    b2_p = jnp.pad(fc2_b.astype(jnp.float32), (0, n_pad - output_dim))[None, :]

    return {
        "w1": w1_p, "b1": b1_p, "w2": w2_p, "b2": b2_p,
        "input_dim": input_dim, "hidden_dim": hidden_dim, "output_dim": output_dim,
    }


def encoder_forward(params, x, *, block_m=None, out_dtype=jnp.float32):
    """Fused forward: relu(x @ W1 + b1) @ W2 + b2.  x: [B, input_dim] f32."""
    B, input_dim = x.shape
    assert input_dim == params["input_dim"]
    w1, b1, w2, b2 = params["w1"], params["b1"], params["w2"], params["b2"]
    k = input_dim
    h_pad = w1.shape[1]
    n_pad = w2.shape[1]
    output_dim = params["output_dim"]
    out_bytes = jnp.dtype(out_dtype).itemsize

    # ---- VMEM-budgeted block_m selection (generation-aware) -------------------
    vmem_cap = _vmem_capacity_bytes()
    vmem_budget = int(0.45 * vmem_cap)

    def est(bm):
        x_tiles = 2 * bm * k * 4 + bm * k * 2          # f32 x tile (x2 buf) + bf16 copy
        o_tiles = 2 * bm * n_pad * out_bytes           # out tile, double buffered
        hidden = bm * h_pad * (4 + 2)                  # f32 activation + bf16 re-feed
        weights = 2 * (k * h_pad * 2 + h_pad * n_pad * 2) + 2 * (h_pad + n_pad) * 4
        return int(1.2 * (x_tiles + o_tiles + hidden + weights))

    max_block = 512
    if block_m is None:
        # Largest tile that fits: small B => single grid step (no pipeline overhead).
        block_m = min(_round_up(B, 8), max_block)
    block_m = max(8, _round_up(block_m, 8))
    # Shrink only on VMEM overflow, never below 128 rows (MXU occupancy on v5e).
    while block_m > 128 and est(block_m) > vmem_budget:
        block_m = _round_up(block_m // 2, 8)

    b_pad = _round_up(B, block_m)
    grid = (b_pad // block_m,)

    # Batch-only zero pad; no K padding, no wrapper-side dtype cast of x.
    x_p = jnp.pad(x, ((0, b_pad - B), (0, 0))) if b_pad != B else x

    vmem_limit = int(min(max(2 * est(block_m), 32 * 1024 * 1024),
                         int(0.75 * vmem_cap)))

    out_p = pl.pallas_call(
        _encoder_kernel,
        out_shape=jax.ShapeDtypeStruct((b_pad, n_pad), out_dtype),
        grid_spec=pltpu.PrefetchScalarGridSpec(
            num_scalar_prefetch=0,
            grid=grid,
            in_specs=[
                pl.BlockSpec((block_m, k), lambda i: (i, 0)),    # x tile (K full extent)
                pl.BlockSpec((k, h_pad), lambda i: (0, 0)),      # W1 (resident, bf16)
                pl.BlockSpec((1, h_pad), lambda i: (0, 0)),      # b1 (f32)
                pl.BlockSpec((h_pad, n_pad), lambda i: (0, 0)),  # W2 (resident, bf16)
                pl.BlockSpec((1, n_pad), lambda i: (0, 0)),      # b2 (f32)
            ],
            out_specs=pl.BlockSpec((block_m, n_pad), lambda i: (i, 0)),
        ),
        compiler_params=pltpu.CompilerParams(
            dimension_semantics=("parallel",),
            vmem_limit_bytes=vmem_limit,
        ),
    )(x_p, w1, b1, w2, b2)

    return out_p[:B, :output_dim]


def custom_graph_encoder(x, fc1_w, fc1_b, fc2_w, fc2_b, **kw):
    """One-shot convenience wrapper (prepares params then runs the kernel)."""
    return encoder_forward(prepare_encoder_params(fc1_w, fc1_b, fc2_w, fc2_b), x, **kw)


if __name__ == "__main__":
    # Small shapes consistent with the module (hidden_dim = 512 in the spec);
    # batch / input / output deliberately NOT multiples of 8/128 to exercise padding.
    batch, input_dim, hidden_dim, output_dim = 40, 48, 512, 24

    key = jax.random.PRNGKey(0)
    kx, kw1, kb1, kw2, kb2 = jax.random.split(key, 5)

    x = jax.random.normal(kx, (batch, input_dim), dtype=jnp.float32)
    # torch nn.Linear layout: weight [out_features, in_features], bias [out_features].
    fc1_w = jax.random.normal(kw1, (hidden_dim, input_dim), dtype=jnp.float32) * 0.05
    fc1_b = jax.random.normal(kb1, (hidden_dim,), dtype=jnp.float32) * 0.05
    fc2_w = jax.random.normal(kw2, (output_dim, hidden_dim), dtype=jnp.float32) * 0.05
    fc2_b = jax.random.normal(kb2, (output_dim,), dtype=jnp.float32) * 0.05

    # Prepare weights once (cached layout), then run the fused kernel.
    params = prepare_encoder_params(fc1_w, fc1_b, fc2_w, fc2_b)
    out = encoder_forward(params, x)
    out = jax.block_until_ready(out)

    # Pure-f32 reference; the kernel feeds the MXU in bf16 with f32 accumulation,
    # so compare with a bf16-appropriate tolerance.
    ref = jnp.maximum(x @ fc1_w.T + fc1_b, 0.0) @ fc2_w.T + fc2_b
    assert out.shape == (batch, output_dim)
    assert jnp.allclose(out, ref, atol=2e-2, rtol=2e-2), float(jnp.max(jnp.abs(out - ref)))

    print("KERNEL_OK")
</pallas_src>

<mosaic_0001>
module attributes {stable_mosaic.version = 11 : i64} {
  func.func @_encoder_kernel(%arg0: i32, %arg1: memref<40x48xf32, #tpu.memory_space<vmem>>, %arg2: memref<48x512xbf16, #tpu.memory_space<vmem>>, %arg3: memref<1x512xf32, #tpu.memory_space<vmem>>, %arg4: memref<512x128xbf16, #tpu.memory_space<vmem>>, %arg5: memref<1x128xf32, #tpu.memory_space<vmem>>, %arg6: memref<40x128xf32, #tpu.memory_space<vmem>>) attributes {dimension_semantics = [#tpu.dimension_semantics<parallel>], iteration_bounds = array<i64: 1>, scalar_prefetch = 0 : i64, scratch_operands = 0 : i64, tpu.core_type = #tpu.core_type<tc>, window_params = [{transform_indices = @transform_0, window_bounds = array<i64: 40, 48>}, {pipeline_mode = #tpu.pipeline_mode<synchronous>, transform_indices = @transform_1, window_bounds = array<i64: 48, 512>}, {pipeline_mode = #tpu.pipeline_mode<synchronous>, transform_indices = @transform_2, window_bounds = array<i64: 1, 512>}, {pipeline_mode = #tpu.pipeline_mode<synchronous>, transform_indices = @transform_3, window_bounds = array<i64: 512, 128>}, {pipeline_mode = #tpu.pipeline_mode<synchronous>, transform_indices = @transform_4, window_bounds = array<i64: 1, 128>}, {transform_indices = @transform_5, window_bounds = array<i64: 40, 128>}]} {
    %c0 = arith.constant 0 : index
    %c0_0 = arith.constant 0 : index
    %0 = vector.load %arg1[%c0, %c0_0] : memref<40x48xf32, #tpu.memory_space<vmem>>, vector<40x48xf32>
    %1 = arith.truncf %0 : vector<40x48xf32> to vector<40x48xbf16>
    %c0_1 = arith.constant 0 : index
    %c0_2 = arith.constant 0 : index
    %2 = vector.load %arg2[%c0_1, %c0_2] : memref<48x512xbf16, #tpu.memory_space<vmem>>, vector<48x512xbf16>
    %cst = arith.constant dense<0.000000e+00> : vector<40x512xf32>
    %3 = tpu.matmul %1, %2, %cst {dimension_numbers = #tpu.dot_dimension_numbers<[1], [0], [0], [1], [0, 0, 1, 1], [], []>} : vector<40x48xbf16>, vector<48x512xbf16>, vector<40x512xf32> -> vector<40x512xf32>
    %c0_3 = arith.constant 0 : index
    %c0_4 = arith.constant 0 : index
    %4 = vector.load %arg3[%c0_3, %c0_4] : memref<1x512xf32, #tpu.memory_space<vmem>>, vector<1x512xf32>
    %5 = vector.broadcast %4 : vector<1x512xf32> to vector<40x512xf32>
    %6 = arith.addf %3, %5 : vector<40x512xf32>
    %cst_5 = arith.constant 0.000000e+00 : f32
    %7 = vector.broadcast %cst_5 : f32 to vector<40x512xf32>
    %8 = arith.maximumf %6, %7 : vector<40x512xf32>
    %9 = arith.truncf %8 : vector<40x512xf32> to vector<40x512xbf16>
    %c0_6 = arith.constant 0 : index
    %c0_7 = arith.constant 0 : index
    %10 = vector.load %arg4[%c0_6, %c0_7] : memref<512x128xbf16, #tpu.memory_space<vmem>>, vector<512x128xbf16>
    %cst_8 = arith.constant dense<0.000000e+00> : vector<40x128xf32>
    %11 = tpu.matmul %9, %10, %cst_8 {dimension_numbers = #tpu.dot_dimension_numbers<[1], [0], [0], [1], [0, 0, 1, 1], [], []>} : vector<40x512xbf16>, vector<512x128xbf16>, vector<40x128xf32> -> vector<40x128xf32>
    %c0_9 = arith.constant 0 : index
    %c0_10 = arith.constant 0 : index
    %12 = vector.load %arg5[%c0_9, %c0_10] : memref<1x128xf32, #tpu.memory_space<vmem>>, vector<1x128xf32>
    %13 = vector.broadcast %12 : vector<1x128xf32> to vector<40x128xf32>
    %14 = arith.addf %11, %13 : vector<40x128xf32>
    %c0_11 = arith.constant 0 : index
    %c0_12 = arith.constant 0 : index
    %15 = vector.load %arg6[%c0_11, %c0_12] : memref<40x128xf32, #tpu.memory_space<vmem>>, vector<40x128xf32>
    tpu.vector_store %arg6[%c0_11, %c0_12], %14 {strides = array<i32>} : memref<40x128xf32, #tpu.memory_space<vmem>>, vector<40x128xf32>,
    return
  }
  func.func @transform_0(%arg0: i32) -> (i32, i32) {
    %c0_i32 = arith.constant 0 : i32
    %c0_i32_0 = arith.constant 0 : i32
    return %arg0, %c0_i32 : i32, i32
  }
  func.func @transform_1(%arg0: i32) -> (i32, i32) {
    %c0_i32 = arith.constant 0 : i32
    %c0_i32_0 = arith.constant 0 : i32
    %c0_i32_1 = arith.constant 0 : i32
    return %c0_i32, %c0_i32_0 : i32, i32
  }
  func.func @transform_2(%arg0: i32) -> (i32, i32) {
    %c0_i32 = arith.constant 0 : i32
    %c0_i32_0 = arith.constant 0 : i32
    %c0_i32_1 = arith.constant 0 : i32
    return %c0_i32, %c0_i32_0 : i32, i32
  }
  func.func @transform_3(%arg0: i32) -> (i32, i32) {
    %c0_i32 = arith.constant 0 : i32
    %c0_i32_0 = arith.constant 0 : i32
    %c0_i32_1 = arith.constant 0 : i32
    return %c0_i32, %c0_i32_0 : i32, i32
  }
  func.func @transform_4(%arg0: i32) -> (i32, i32) {
    %c0_i32 = arith.constant 0 : i32
    %c0_i32_0 = arith.constant 0 : i32
    %c0_i32_1 = arith.constant 0 : i32
    return %c0_i32, %c0_i32_0 : i32, i32
  }
  func.func @transform_5(%arg0: i32) -> (i32, i32) {
    %c0_i32 = arith.constant 0 : i32
    %c0_i32_0 = arith.constant 0 : i32
    return %arg0, %c0_i32 : i32, i32
  }
}

</mosaic_0001>

<bundles_post_ra>
// kernel: tpu_custom_call.1
= control target key start
LH: loop header
LB: loop body
LE: loop exit
PB: predicated region body
PF: predicated region fallthrough
CT: control target
= control target key end

     0   :  { %10 = vsyncpa [#allocation3], 0  ;;  %s1162_s0 = inlined_call_operand.hbm [shape: f32[40,48], index: 0, kind: input, shape index: {}]   ;;  %s1163_s1 = inlined_call_operand.hbm [shape: bf16[48,512], index: 1, kind: input, shape index: {}]   ;;  %s1164_s2 = inlined_call_operand.hbm [shape: f32[1,512], index: 2, kind: input, shape index: {}]   ;;  %s1165_s3 = inlined_call_operand.hbm [shape: bf16[512,128], index: 3, kind: input, shape index: {}]   ;;  %s1166_s4 = inlined_call_operand.vmem [shape: f32[1,128], index: 4, kind: input, shape index: {}]   ;;  %s1167_s5 = inlined_call_operand.hbm [shape: f32[40,128], index: 5, kind: output, shape index: {}]  }
   0x1   :  { %11 = vsyncpa [#allocation6], 0 }
   0x2   :  { %12 = vsyncpa [#allocation9], 0  ;;  %s31_s20 = sshll.u32 %s1163_s1, 4  ;;  %s32_s20 = int_to_ptr.hbm [resolvable:$true] %s31_s20 }
   0x3   :  { %13 = vsyncpa [#allocation4], 0  ;;  %s1057_s21 = smov [#allocation5]   ;;  %s18_s25 = sshll.u32 %s1162_s0, 4  ;;  %s19_s25 = int_to_ptr.hbm [resolvable:$true] %s18_s25 }
   0x4   :  { %s33_s22 = sshll.u32 %s1057_s21, 4  ;;  %s1058_s26 = smov 256   ;;  %s34_s22 = int_to_ptr.vmem [resolvable:$true] %s33_s22 }
   0x5   :  { %s1059_s27 = smov 16   ;;  %s1060_s28 = smov [#allocation2]  }
   0x6   :  { %39 = dma.hbm_to_vmem [thread:$0]  %s32_s20, 1536, %s34_s22, [#allocation6], %s1058_s26, %s1058_s26, %s1059_s27  }
   0x7   :  { %s20_s29 = sshll.u32 %s1060_s28, 4  ;;  %s1061_s30 = smov 128   ;;  %s21_s29 = int_to_ptr.vmem [resolvable:$true] %s20_s29 }
   0x8   :  { %s1062_s6 = smov 8   ;;  %s45_s8 = sshll.u32 %s1164_s2, 4  ;;  %s46_s8 = int_to_ptr.hbm [resolvable:$true] %s45_s8 }
   0x9   :  { %26 = dma.hbm_to_vmem [thread:$0]  %s19_s25, 640, %s21_s29, [#allocation3], %s1061_s30, %s1061_s30, %s1062_s6  }
   0xa   :  { %s1063_s9 = smov [#allocation7]   ;;  %s55_s12 = sshll.u32 %s1165_s3, 4  ;;  %s56_s12 = int_to_ptr.hbm [resolvable:$true] %s55_s12 }
   0xb   :  { %s47_s0 = sshll.u32 %s1063_s9, 4  ;;  %s1064_s13 = smov [#allocation8]   ;;  %s48_s0 = int_to_ptr.vmem [resolvable:$true] %s47_s0 }
   0xc   :  { %50 = dma.hbm_to_vmem [thread:$0]  %s46_s8, 64, %s48_s0, [#allocation6]  }
   0xd   :  { %s57_s14 = sshll.u32 %s1064_s13, 4  ;;  %s1065_s15 = smov 64   ;;  %s58_s14 = int_to_ptr.vmem [resolvable:$true] %s57_s14 }
   0xe   :  { %s1066_s16 = smov 4  }
   0xf   :  { %63 = dma.hbm_to_vmem [thread:$0]  %s56_s12, 4096, %s58_s14, [#allocation9], %s1065_s15, %s1065_s15, %s1066_s16  }
  0x10   :  { %1049 = dma.done.wait [#allocation3], 640  }
  0x11   :  { %1050 = vsyncadd [#allocation3], 4294966656 }
  0x12   :  { %1051 = dma.done.wait [#allocation6], 1600  }
  0x13   :  { %1052 = vsyncadd [#allocation6], 4294965696 }
  0x14   :  { %1053 = dma.done.wait [#allocation9], 4096  }
  0x15   :  { %1054 = vsyncadd [#allocation9], 4294963200  ;;  %v719_v0 = vld [vmem:[#allocation5 + $0x40] sm:$0xf]  ;;  %v883_v1 = vld [vmem:[#allocation5 + $0x4c] sm:$0xf0] }
  0x16   :  { %v881_v2 = vld [vmem:[#allocation5 + $0x44] sm:$0xf]  ;;  %v720_v3 = vor.u32 %v883_v1, %v719_v0  ;;  %v721_v4 = vld [vmem:[#allocation5 + $0x50] sm:$0xf0]  ;;  %v727_v5 = vld [vmem:[#allocation5 + $0x48] sm:$0xf] }
  0x17   :  { %v884_v6 = vld [vmem:[#allocation5 + $0x54] sm:$0xf0]  ;;  %v724_v7 = vor.u32 %v881_v2, %v721_v4  ;;  %v882_v9 = vld [vmem:[#allocation5 + $0x4c] sm:$0xf]  ;;  %v729_v10 = vld [vmem:[#allocation5 + $0x58] sm:$0xf0] }
  0x18   :  { %v728_v8 = vor.u32 %v884_v6, %v727_v5  ;;  %v703_v11 = vld [vmem:[#allocation5 + $0x20] sm:$0xf]  ;;  %188 = vmatpush.bf16.msra.mxu0 %v720_v3  ;;  %v732_v12 = vor.u32 %v882_v9, %v729_v10  ;;  %v879_v13 = vld [vmem:[#allocation5 + $0x2c] sm:$0xf0]  ;;  %v877_v14 = vld [vmem:[#allocation5 + $0x24] sm:$0xf] }
  0x19   :  { %v705_v15 = vld [vmem:[#allocation5 + $0x30] sm:$0xf0]  ;;  %211 = vmatpush.bf16.msra.mxu1 %v724_v7  ;;  %v704_v16 = vor.u32 %v879_v13, %v703_v11  ;;  %v711_v18 = vld [vmem:[#allocation5 + $0x28] sm:$0xf]  ;;  %v880_v19 = vld [vmem:[#allocation5 + $0x34] sm:$0xf0] }
  0x1a   :  { %234 = vmatpush.bf16.msra.mxu2 %v728_v8  ;;  %v708_v17 = vor.u32 %v877_v14, %v705_v15  ;;  %v878_v20 = vld [vmem:[#allocation5 + $0x2c] sm:$0xf]  ;;  %257 = vmatpush.bf16.msra.mxu3 %v732_v12  ;;  %v712_v21 = vor.u32 %v880_v19, %v711_v18  ;;  %v713_v22 = vld [vmem:[#allocation5 + $0x38] sm:$0xf0]  ;;  %v687_v23 = vld [vmem:[#allocation5] sm:$0xf] }
  0x1b   :  { %v875_v24 = vld [vmem:[#allocation5 + $0xc] sm:$0xf0]  ;;  %v716_v25 = vor.u32 %v878_v20, %v713_v22  ;;  %v873_v26 = vld [vmem:[#allocation5 + $0x4] sm:$0xf]  ;;  %v689_v27 = vld [vmem:[#allocation5 + $0x10] sm:$0xf0] }
  0x1c   :  { %v695_v28 = vld [vmem:[#allocation5 + $0x8] sm:$0xf]  ;;  %189 = vmatpush.bf16.msra.mxu0 %v704_v16  ;;  %v688_v29 = vor.u32 %v875_v24, %v687_v23  ;;  %v876_v30 = vld [vmem:[#allocation5 + $0x14] sm:$0xf0]  ;;  %v874_v31 = vld [vmem:[#allocation5 + $0xc] sm:$0xf]  ;;  %v692_v33 = vor.u32 %v873_v26, %v689_v27 }
  0x1d   :  { %v697_v32 = vld [vmem:[#allocation5 + $0x18] sm:$0xf0]  ;;  %212 = vmatpush.bf16.msra.mxu1 %v708_v17  ;;  %v696_v34 = vor.u32 %v876_v30, %v695_v28  ;;  %v84_v36 = vld [vmem:[#allocation2 + $0x8] sm:$0xff]  ;;  %vm173_vm0 = vcmask 392192   ;;  %v907_v43 = vld [vmem:[#allocation8 + $0xb0] sm:$0xff]  ;;  %s670_s20 = sshll.u32 %s1167_s5, 4  ;;  %s671_s20 = int_to_ptr.hbm [resolvable:$true] %s670_s20 }
  0x1e   :  { %235 = vmatpush.bf16.msra.mxu2 %v712_v21  ;;  %v83_v35 = vld [vmem:[#allocation2] sm:$0xff]  ;;  %258 = vmatpush.bf16.msra.mxu3 %v716_v25  ;;  %v700_v37 = vor.u32 %v874_v31, %v697_v32  ;;  %v85_v47 = vld [vmem:[#allocation2 + $0x10] sm:$0xff]  ;;  %v86_v50 = vld [vmem:[#allocation2 + $0x18] sm:$0xff] }
  0x1f   :  { %v88_v38 = vpack.c.bf16 %v84_v36, %v83_v35  ;;  %v908_v39 = vld [vmem:[#allocation8 + $0xb8] sm:$0xff]  ;;  %v915_v44 = vld [vmem:[#allocation8 + $0xf0] sm:$0xff]  ;;  %v906_v48 = vld [vmem:[#allocation8 + $0xa8] sm:$0xff]  ;;  %v89_v53 = vpack.c.bf16 %v86_v50, %v85_v47 }
  0x20   :  { %190 = vmatpush.bf16.msra.mxu0 %v688_v29  ;;  %v916_v40 = vld [vmem:[#allocation8 + $0xf8] sm:$0xff]  ;;  %v891_v45 = vld [vmem:[#allocation8 + $0x30] sm:$0xff]  ;;  %v914_v49 = vld [vmem:[#allocation8 + $0xe8] sm:$0xff] }
  0x21   :  { %213 = vmatpush.bf16.msra.mxu1 %v692_v33  ;;  %v892_v41 = vld [vmem:[#allocation8 + $0x38] sm:$0xff]  ;;  %v899_v46 = vld [vmem:[#allocation8 + $0x70] sm:$0xff]  ;;  %v890_v51 = vld [vmem:[#allocation8 + $0x28] sm:$0xff] }
  0x22   :  { %236 = vmatpush.bf16.msra.mxu2 %v696_v34  ;;  %259 = vmatpush.bf16.msra.mxu3 %v700_v37  ;;  %v900_v42 = vld [vmem:[#allocation8 + $0x78] sm:$0xff]  ;;  %v898_v52 = vld [vmem:[#allocation8 + $0x68] sm:$0xff]  ;;  %v905_v54 = vld [vmem:[#allocation8 + $0xa0] sm:$0xff] }
  0x23   :  { %733 = vmatmul.msk.bf16.vlgmr.msra.gmra.mxu0 %vm173_vm0, %v88_v38  ;;  %v889_v55 = vld [vmem:[#allocation8 + $0x20] sm:$0xff]  ;;  %v904_v58 = vld [vmem:[#allocation8 + $0x98] sm:$0xff]  ;;  %v903_v0 = vld [vmem:[#allocation8 + $0x90] sm:$0xff] }
  0x24   :  { %736 = vmatmul.msk.bf16.vlgmr.msra.gmra.mxu1 %vm173_vm0, %v88_v38  ;;  %567 = vmatpush.bf16.msrb.mxu0 %v892_v41  ;;  %v913_v56 = vld [vmem:[#allocation8 + $0xe0] sm:$0xff]  ;;  %v912_v59 = vld [vmem:[#allocation8 + $0xd8] sm:$0xff]  ;;  %v911_v1 = vld [vmem:[#allocation8 + $0xd0] sm:$0xff] }
  0x25   :  { %739 = vmatmul.msk.bf16.vlgmr.msra.gmra.mxu2 %vm173_vm0, %v88_v38  ;;  %742 = vmatmul.msk.bf16.vlgmr.msra.gmra.mxu3 %vm173_vm0, %v88_v38  ;;  %v897_v57 = vld [vmem:[#allocation8 + $0x60] sm:$0xff]  ;;  %v87_v60 = vld [vmem:[#allocation2 + $0x20] sm:$0xff]  ;;  %v886_v4 = vld [vmem:[#allocation8 + $0x8] sm:$0xff] }
  0x26   :  { %613 = vmatpush.bf16.msrb.mxu2 %v908_v39  ;;  %636 = vmatpush.bf16.msrb.mxu3 %v916_v40  ;;  %v90_v61 = vpack.c.bf16 %v87_v60, %v87_v60  ;;  %v888_v62 = vld [vmem:[#allocation8 + $0x18] sm:$0xff]  ;;  %v887_v2 = vld [vmem:[#allocation8 + $0x10] sm:$0xff]  ;;  %v894_v5 = vld [vmem:[#allocation8 + $0x48] sm:$0xff] }
  0x27   :  { %590 = vmatpush.bf16.msrb.mxu1 %v900_v42  ;;  %v896_v63 = vld [vmem:[#allocation8 + $0x58] sm:$0xff]  ;;  %v895_v3 = vld [vmem:[#allocation8 + $0x50] sm:$0xff]  ;;  %v885_v6 = vld [vmem:[#allocation8] sm:$0xff] }
  0x28   :  { %568 = vmatpush.bf16.msrb.mxu0 %v891_v45  ;;  %v893_v7 = vld [vmem:[#allocation8 + $0x40] sm:$0xff]  ;;  %v902_v8 = vld [vmem:[#allocation8 + $0x88] sm:$0xff]  ;;  %v103_v12 = vld [vmem:[#allocation7] sm:$0xf] }
  0x29   :  { %v910_v9 = vld [vmem:[#allocation8 + $0xc8] sm:$0xff]  ;;  %v901_v10 = vld [vmem:[#allocation8 + $0x80] sm:$0xff]  ;;  %v1125_v14 = vperm.slane %v103_v12, 0  ;;  %v1127_v16 = vperm.slane %v103_v12, 1  ;;  %v1132_v26 = vperm.slane %v103_v12, 2  ;;  %v1135_v28 = vperm.slane %v103_v12, 3 }
  0x2a   :  { %614 = vmatpush.bf16.msrb.mxu2 %v907_v43  ;;  %637 = vmatpush.bf16.msrb.mxu3 %v915_v44  ;;  %v909_v11 = vld [vmem:[#allocation8 + $0xc0] sm:$0xff] }
  0x2b   :  { %591 = vmatpush.bf16.msrb.mxu1 %v899_v46 }
  0x2c   :  { %569 = vmatpush.bf16.msrb.mxu0 %v890_v51 }
  0x2e   :  { %615 = vmatpush.bf16.msrb.mxu2 %v906_v48  ;;  %638 = vmatpush.bf16.msrb.mxu3 %v914_v49 }
  0x2f   :  { %592 = vmatpush.bf16.msrb.mxu1 %v898_v52 }
  0x30   :  { %570 = vmatpush.bf16.msrb.mxu0 %v889_v55 }
  0x32   :  { %616 = vmatpush.bf16.msrb.mxu2 %v905_v54  ;;  %639 = vmatpush.bf16.msrb.mxu3 %v913_v56 }
  0x33   :  { %734 = vmatmul.msk.bf16.gmra.mxu0 %vm173_vm0, %v89_v53  ;;  %593 = vmatpush.bf16.msrb.mxu1 %v897_v57 }
  0x34   :  { %737 = vmatmul.msk.bf16.gmra.mxu1 %vm173_vm0, %v89_v53  ;;  %571 = vmatpush.bf16.msrb.mxu0 %v888_v62 }
  0x35   :  { %740 = vmatmul.msk.bf16.gmra.mxu2 %vm173_vm0, %v89_v53  ;;  %743 = vmatmul.msk.bf16.gmra.mxu3 %vm173_vm0, %v89_v53 }
  0x36   :  { %617 = vmatpush.bf16.msrb.mxu2 %v904_v58  ;;  %640 = vmatpush.bf16.msrb.mxu3 %v912_v59 }
  0x37   :  { %594 = vmatpush.bf16.msrb.mxu1 %v896_v63 }
  0x38   :  { %572 = vmatpush.bf16.msrb.mxu0 %v887_v2 }
  0x3a   :  { %618 = vmatpush.bf16.msrb.mxu2 %v903_v0  ;;  %641 = vmatpush.bf16.msrb.mxu3 %v911_v1 }
  0x3b   :  { %595 = vmatpush.bf16.msrb.mxu1 %v895_v3 }
  0x3c   :  { %573 = vmatpush.bf16.msrb.mxu0 %v886_v4 }
  0x3e   :  { %619 = vmatpush.bf16.msrb.mxu2 %v902_v8  ;;  %642 = vmatpush.bf16.msrb.mxu3 %v910_v9 }
  0x3f   :  { %596 = vmatpush.bf16.msrb.mxu1 %v894_v5 }
  0x40   :  { %574 = vmatpush.bf16.msrb.mxu0 %v885_v6 }
  0x42   :  { %620 = vmatpush.bf16.msrb.mxu2 %v901_v10  ;;  %643 = vmatpush.bf16.msrb.mxu3 %v909_v11 }
  0x43   :  { %735 = vmatmul.msk.bf16.gmra.mxu0 %vm173_vm0, %v90_v61  ;;  %597 = vmatpush.bf16.msrb.mxu1 %v893_v7 }
  0x44   :  { %738 = vmatmul.msk.bf16.gmra.mxu1 %vm173_vm0, %v90_v61 }
  0x45   :  { %741 = vmatmul.msk.bf16.gmra.mxu2 %vm173_vm0, %v90_v61  ;;  %744 = vmatmul.msk.bf16.gmra.mxu3 %vm173_vm0, %v90_v61 }
  0xa0   :  { %v192_v13 = vpop.f32.mrf.mxu0 }
  0xa1   :  { %v215_v15 = vpop.f32.mrf.mxu1  ;;  %v193_v17 = vadd.f32 %v192_v13, %v1125_v14 }
  0xa2   :  { %v216_v18 = vadd.f32 %v215_v15, %v1127_v16 }
  0xa3   :  { %v275_v22 = vmax.f32 %v193_v17, 0.0 }
  0xa4   :  { %v276_v25 = vmax.f32 %v216_v18, 0.0 }
  0xa8   :  { %v238_v19 = vpop.f32.mrf.mxu2  ;;  %v261_v20 = vpop.f32.mrf.mxu3 }
  0xa9   :  { %v194_v21 = vpop.f32.mrf.mxu0  ;;  %v217_v24 = vpop.f32.mrf.mxu1  ;;  %v239_v32 = vadd.f32 %v238_v19, %v1132_v26  ;;  %v262_v34 = vadd.f32 %v261_v20, %v1135_v28 }
  0xaa   :  { %v195_v23 = vadd.f32 %v194_v21, %v1125_v14  ;;  %v218_v27 = vadd.f32 %v217_v24, %v1127_v16 }
  0xab   :  { %v277_v41 = vmax.f32 %v239_v32, 0.0  ;;  %v278_v43 = vmax.f32 %v262_v34, 0.0 }
  0xac   :  { %v279_v29 = vmax.f32 %v195_v23, 0.0  ;;  %v280_v30 = vmax.f32 %v218_v27, 0.0 }
  0xae   :  { %v295_v31 = vpack.c.bf16 %v279_v29, %v275_v22  ;;  %v296_v33 = vpack.c.bf16 %v280_v30, %v276_v25 }
  0xb0   :  { %v240_v35 = vpop.f32.mrf.mxu2  ;;  %575 = vmatmul.bf16.vlgmr.msrb.gmra.mxu0 %v295_v31  ;;  %v263_v37 = vpop.f32.mrf.mxu3  ;;  %598 = vmatmul.bf16.vlgmr.msrb.gmra.mxu1 %v296_v33 }
  0xb1   :  { %v241_v36 = vadd.f32 %v240_v35, %v1132_v26  ;;  %v197_v38 = vpop.f32.mrf.mxu0  ;;  %v264_v39 = vadd.f32 %v263_v37, %v1135_v28  ;;  %v220_v40 = vpop.f32.mrf.mxu1 }
  0xb2   :  { %v198_v47 = vadd.f32 %v197_v38, %v1125_v14  ;;  %v221_v48 = vadd.f32 %v220_v40, %v1127_v16 }
  0xb3   :  { %v281_v42 = vmax.f32 %v241_v36, 0.0  ;;  %v282_v44 = vmax.f32 %v264_v39, 0.0 }
  0xb4   :  { %v283_v52 = vmax.f32 %v198_v47, 0.0  ;;  %v284_v55 = vmax.f32 %v221_v48, 0.0 }
  0xb5   :  { %v297_v45 = vpack.c.bf16 %v281_v42, %v277_v41  ;;  %v298_v46 = vpack.c.bf16 %v282_v44, %v278_v43 }
  0xb7   :  { %621 = vmatmul.bf16.vlgmr.msrb.gmra.mxu2 %v297_v45  ;;  %644 = vmatmul.bf16.vlgmr.msrb.gmra.mxu3 %v298_v46 }
  0xb8   :  { %v243_v49 = vpop.f32.mrf.mxu2  ;;  %v266_v50 = vpop.f32.mrf.mxu3 }
  0xb9   :  { %v199_v51 = vpop.f32.mrf.mxu0  ;;  %v222_v54 = vpop.f32.mrf.mxu1  ;;  %v244_v60 = vadd.f32 %v243_v49, %v1132_v26  ;;  %v267_v62 = vadd.f32 %v266_v50, %v1135_v28 }
  0xba   :  { %v200_v53 = vadd.f32 %v199_v51, %v1125_v14  ;;  %v223_v56 = vadd.f32 %v222_v54, %v1127_v16 }
  0xbb   :  { %v285_v5 = vmax.f32 %v244_v60, 0.0  ;;  %v286_v7 = vmax.f32 %v267_v62, 0.0 }
  0xbc   :  { %v287_v57 = vmax.f32 %v200_v53, 0.0  ;;  %v288_v58 = vmax.f32 %v223_v56, 0.0 }
  0xbe   :  { %v299_v59 = vpack.c.bf16 %v287_v57, %v283_v52  ;;  %v300_v61 = vpack.c.bf16 %v288_v58, %v284_v55 }
  0xc0   :  { %v245_v63 = vpop.f32.mrf.mxu2  ;;  %580 = vmatmul.bf16.gmra.mxu0 %v299_v59  ;;  %v268_v1 = vpop.f32.mrf.mxu3  ;;  %603 = vmatmul.bf16.gmra.mxu1 %v300_v61 }
  0xc1   :  { %v246_v0 = vadd.f32 %v245_v63, %v1132_v26  ;;  %v202_v2 = vpop.f32.mrf.mxu0  ;;  %v269_v3 = vadd.f32 %v268_v1, %v1135_v28  ;;  %v225_v4 = vpop.f32.mrf.mxu1 }
  0xc2   :  { %v203_v9 = vadd.f32 %v202_v2, %v1125_v14  ;;  %v226_v11 = vadd.f32 %v225_v4, %v1127_v16 }
  0xc3   :  { %v289_v6 = vmax.f32 %v246_v0, 0.0  ;;  %v290_v8 = vmax.f32 %v269_v3, 0.0 }
  0xc4   :  { %v291_v15 = vmax.f32 %v203_v9, 0.0  ;;  %v292_v18 = vmax.f32 %v226_v11, 0.0 }
  0xc5   :  { %v301_v10 = vpack.c.bf16 %v289_v6, %v285_v5  ;;  %v302_v12 = vpack.c.bf16 %v290_v8, %v286_v7 }
  0xc6   :  { %v303_v23 = vpack.c.bf16 %v291_v15, %v291_v15  ;;  %v304_v24 = vpack.c.bf16 %v292_v18, %v292_v18 }
  0xc7   :  { %626 = vmatmul.bf16.gmra.mxu2 %v301_v10  ;;  %649 = vmatmul.bf16.gmra.mxu3 %v302_v12 }
  0xc8   :  { %v248_v13 = vpop.f32.mrf.mxu2  ;;  %v271_v17 = vpop.f32.mrf.mxu3 }
  0xc9   :  { %v204_v19 = vpop.f32.mrf.mxu0  ;;  %v227_v20 = vpop.f32.mrf.mxu1  ;;  %v249_v21 = vadd.f32 %v248_v13, %v1132_v26  ;;  %v272_v22 = vadd.f32 %v271_v17, %v1135_v28  ;;  %v928_v26 = vld [vmem:[%s1166_s4] ss:$0 sm:$0xff]  ;;  %s1067_s4 = smov [#allocation10]  }
  0xca   :  { %s668_s17 = sshll.u32 %s1067_s4, 4  ;;  %s669_s17 = int_to_ptr.vmem [resolvable:$true] %s668_s17 }
  0xcb   :  { %v293_v25 = vmax.f32 %v249_v21, 0.0  ;;  %v294_v14 = vmax.f32 %v272_v22, 0.0 }
  0xcd   :  { %v305_v29 = vpack.c.bf16 %v293_v25, %v293_v25  ;;  %v306_v30 = vpack.c.bf16 %v294_v14, %v294_v14 }
  0xd0   :  { %v250_v27 = vpop.f32.mrf.mxu2  ;;  %585 = vmatmul.bf16.gmra.mxu0 %v303_v23  ;;  %v273_v16 = vpop.f32.mrf.mxu3  ;;  %608 = vmatmul.bf16.gmra.mxu1 %v304_v24 }
  0xd7   :  { %631 = vmatmul.bf16.gmra.mxu2 %v305_v29  ;;  %654 = vmatmul.bf16.gmra.mxu3 %v306_v30 }
 0x12d   :  { %v576_v31 = vpop.f32.mrf.mxu0  ;;  %v599_v32 = vpop.f32.mrf.mxu1 }
 0x12e   :  { %v577_v33 = vadd.f32 %v928_v26, %v576_v31 }
 0x130   :  { %v600_v35 = vadd.f32 %v599_v32, %v577_v33 }
 0x135   :  { %v578_v28 = vpop.f32.mrf.mxu0  ;;  %v601_v34 = vpop.f32.mrf.mxu1 }
 0x136   :  { %v579_v39 = vadd.f32 %v928_v26, %v578_v28 }
 0x138   :  { %v602_v43 = vadd.f32 %v601_v34, %v579_v39 }
 0x13a   :  { %v622_v36 = vpop.f32.mrf.mxu2  ;;  %v645_v38 = vpop.f32.mrf.mxu3 }
 0x13b   :  { %v623_v37 = vadd.f32 %v622_v36, %v600_v35 }
 0x13d   :  { %v646_v40 = vadd.f32 %v645_v38, %v623_v37  ;;  %v581_v41 = vpop.f32.mrf.mxu0  ;;  %v604_v42 = vpop.f32.mrf.mxu1 }
 0x13e   :  { %v582_v47 = vadd.f32 %v928_v26, %v581_v41 }
 0x13f   :  { %659 = vst [vmem:[#allocation10] sm:$0xff] %v646_v40 }
 0x140   :  { %v605_v51 = vadd.f32 %v604_v42, %v582_v47 }
 0x142   :  { %v624_v44 = vpop.f32.mrf.mxu2  ;;  %v647_v46 = vpop.f32.mrf.mxu3 }
 0x143   :  { %v625_v45 = vadd.f32 %v624_v44, %v602_v43 }
 0x145   :  { %v648_v48 = vadd.f32 %v647_v46, %v625_v45  ;;  %v583_v49 = vpop.f32.mrf.mxu0  ;;  %v606_v50 = vpop.f32.mrf.mxu1 }
 0x146   :  { %v584_v55 = vadd.f32 %v928_v26, %v583_v49 }
 0x147   :  { %660 = vst [vmem:[#allocation10 + $0x8] sm:$0xff] %v648_v48 }
 0x148   :  { %v607_v59 = vadd.f32 %v606_v50, %v584_v55 }
 0x14a   :  { %v627_v52 = vpop.f32.mrf.mxu2  ;;  %v650_v54 = vpop.f32.mrf.mxu3 }
 0x14b   :  { %v628_v53 = vadd.f32 %v627_v52, %v605_v51 }
 0x14d   :  { %v651_v56 = vadd.f32 %v650_v54, %v628_v53  ;;  %v586_v57 = vpop.f32.mrf.mxu0  ;;  %v609_v58 = vpop.f32.mrf.mxu1 }
 0x14e   :  { %v587_v61 = vadd.f32 %v928_v26, %v586_v57 }
 0x14f   :  { %661 = vst [vmem:[#allocation10 + $0x10] sm:$0xff] %v651_v56 }
 0x150   :  { %v610_v3 = vadd.f32 %v609_v58, %v587_v61 }
 0x152   :  { %v629_v60 = vpop.f32.mrf.mxu2  ;;  %v652_v63 = vpop.f32.mrf.mxu3 }
 0x153   :  { %v630_v62 = vadd.f32 %v629_v60, %v607_v59 }
 0x155   :  { %v653_v0 = vadd.f32 %v652_v63, %v630_v62  ;;  %v588_v1 = vpop.f32.mrf.mxu0  ;;  %v611_v2 = vpop.f32.mrf.mxu1 }
 0x157   :  { %662 = vst [vmem:[#allocation10 + $0x18] sm:$0xff] %v653_v0 }
 0x15a   :  { %v632_v4 = vpop.f32.mrf.mxu2  ;;  %v655_v6 = vpop.f32.mrf.mxu3 }
 0x15b   :  { %v633_v5 = vadd.f32 %v632_v4, %v610_v3 }
 0x15d   :  { %v656_v7 = vadd.f32 %v655_v6, %v633_v5 }
 0x15f   :  { %663 = vst [vmem:[#allocation10 + $0x20] sm:$0xff] %v656_v7 }
 0x160   :  { %676 = dma.vmem_to_hbm [thread:$0]  %s669_s17, 640, %s671_s20, [#allocation4], %s1061_s30, %s1061_s30, %s1062_s6  }
 0x162   :  { %v634_v8 = vpop.f32.mrf.mxu2  ;;  %v657_v9 = vpop.f32.mrf.mxu3 }
 0x163   :  { %1055 = dma.done.wait [#allocation4], 640  }
 0x164   :  { %1056 = vsyncadd [#allocation4], 4294966656 }
 0x165   :  { %681 = vsyncpa [#allocation3], 1 }
 0x166   :  { %682 = vsyncpa [#allocation6], 1 }
 0x167   :  { %683 = vsyncpa [#allocation9], 1 }
 0x168   :  { %684 = vsyncpa [#allocation4], 1 }

</bundles_post_ra>
